<compile_context>
chip_gen: v5e
topology: v5e:2x2
jax: 0.10.0
libtpu: 0.0.40
codegen_flags: <defaults>
</compile_context>

<pallas_src>
import functools

import jax
import jax.numpy as jnp
from jax import lax
from jax.experimental import pallas as pl
from jax.experimental.pallas import tpu as pltpu

NEG_INF = -1e30   # finite "minus infinity" for masked pad lanes
LANE = 128        # TPU lane width: class dim is padded to a multiple of this


def _round_up(x, m):
    return ((x + m - 1) // m) * m


def _choose_tile_b(batch, d, c_pad, budget_bytes=24 << 20):
    """Largest batch tile whose double-buffered blocks fit the VMEM budget.

    Budget (24 MiB) is safe under the default/raised scoped-VMEM limit on
    v5e/v6e (128 MiB physical) and v7x (64 MiB physical).
    """
    w_bytes = d * c_pad * 4                 # resident, grid-invariant weight
    per_row = 2 * (d + c_pad) * 4           # double-buffered x row + out row
    max_rows = max((budget_bytes - w_bytes) // max(per_row, 1), 8)
    tile = min(1024, int(max_rows), _round_up(batch, 8))
    return max(8, (tile // 8) * 8)


def _compiler_params():
    return pltpu.CompilerParams(
        dimension_semantics=("parallel",),          # shard batch tiles across TCs
        vmem_limit_bytes=32 * 1024 * 1024,
    )


def _logits(x_ref, w_ref, b_ref):
    # x (TILE_B, D) @ W (C_pad, D) contracted on D  -> (TILE_B, C_pad), f32 acc.
    return lax.dot_general(
        x_ref[...], w_ref[...],
        dimension_numbers=(((1,), (1,)), ((), ())),
        preferred_element_type=jnp.float32,
    ) + b_ref[...]


def _linear_softmax_kernel(x_ref, w_ref, b_ref, o_ref):
    logits = _logits(x_ref, w_ref, b_ref)
    # Numerically stable softmax over the class dim.  Pad lanes carry a NEG_INF
    # bias, so exp(pad - m) underflows to 0 and the distribution is not diluted.
    m = jnp.max(logits, axis=-1, keepdims=True)
    e = jnp.exp(logits - m)
    denom = jnp.sum(e, axis=-1, keepdims=True)
    o_ref[...] = (e / denom).astype(o_ref.dtype)


def _linear_softmax_nll_kernel(x_ref, w_ref, b_ref, yoh_ref, nll_ref, *,
                               num_classes):
    logits = _logits(x_ref, w_ref, b_ref)
    m = jnp.max(logits, axis=-1, keepdims=True)
    e = jnp.exp(logits - m)
    probs = e / jnp.sum(e, axis=-1, keepdims=True)          # pad lanes ~ 0
    # Faithful to the PyTorch module: CrossEntropyLoss applies log_softmax on
    # top of the already-softmaxed probabilities (double-softmax quirk).
    c_pad = probs.shape[-1]
    lane = lax.broadcasted_iota(jnp.int32, (1, c_pad), 1)
    z = jnp.where(lane < num_classes, probs, NEG_INF)       # only real classes
    m2 = jnp.max(z, axis=-1, keepdims=True)
    e2 = jnp.exp(z - m2)
    logp = z - m2 - jnp.log(jnp.sum(e2, axis=-1, keepdims=True))
    # One-hot labels are zero on pad lanes, so this selects the label column.
    nll = -jnp.sum(yoh_ref[...] * logp, axis=-1, keepdims=True)
    nll_ref[...] = nll.astype(nll_ref.dtype)


def _pad_params(w, b, c_pad):
    c, d = w.shape
    w_pad = jnp.zeros((c_pad, d), w.dtype).at[:c, :].set(w)
    b_pad = jnp.full((1, c_pad), NEG_INF, dtype=b.dtype).at[0, :c].set(b)
    return w_pad, b_pad


def linear_softmax(x, w, b, *, tile_b=None):
    """y_pred = softmax(x @ w.T + b, axis=1), batch-tiled Pallas kernel."""
    B, D = x.shape
    C = w.shape[0]
    C_pad = _round_up(max(C, LANE), LANE)
    tile_b = _choose_tile_b(B, D, C_pad) if tile_b is None else tile_b
    B_pad = _round_up(B, tile_b)
    x_p = jnp.pad(x, ((0, B_pad - B), (0, 0))) if B_pad != B else x
    w_pad, b_pad = _pad_params(w, b, C_pad)
    # TODO(synk): add a K-reduction grid axis (f32 accumulator scratch) if
    # input_size ever grows beyond the single-block VMEM budget.
    out = pl.pallas_call(
        _linear_softmax_kernel,
        out_shape=jax.ShapeDtypeStruct((B_pad, C_pad), x.dtype),
        grid=(B_pad // tile_b,),
        in_specs=[
            pl.BlockSpec((tile_b, D), lambda i: (i, 0)),
            pl.BlockSpec((C_pad, D), lambda i: (0, 0)),   # resident weight
            pl.BlockSpec((1, C_pad), lambda i: (0, 0)),   # resident bias
        ],
        out_specs=pl.BlockSpec((tile_b, C_pad), lambda i: (i, 0)),
        compiler_params=_compiler_params(),
    )(x_p, w_pad, b_pad)
    return out[:B, :C]


def linear_softmax_nll(x, w, b, labels, *, tile_b=None):
    """Per-row CrossEntropy(softmax(xW^T+b), labels) fused in one kernel -> (B,)."""
    B, D = x.shape
    C = w.shape[0]
    C_pad = _round_up(max(C, LANE), LANE)
    tile_b = _choose_tile_b(B, D, C_pad) if tile_b is None else tile_b
    B_pad = _round_up(B, tile_b)
    x_p = jnp.pad(x, ((0, B_pad - B), (0, 0))) if B_pad != B else x
    yoh = jax.nn.one_hot(labels, C_pad, dtype=jnp.float32)  # zeros on pad lanes
    yoh_p = jnp.pad(yoh, ((0, B_pad - B), (0, 0))) if B_pad != B else yoh
    w_pad, b_pad = _pad_params(w, b, C_pad)
    nll = pl.pallas_call(
        functools.partial(_linear_softmax_nll_kernel, num_classes=C),
        out_shape=jax.ShapeDtypeStruct((B_pad, 1), jnp.float32),
        grid=(B_pad // tile_b,),
        in_specs=[
            pl.BlockSpec((tile_b, D), lambda i: (i, 0)),
            pl.BlockSpec((C_pad, D), lambda i: (0, 0)),   # resident weight
            pl.BlockSpec((1, C_pad), lambda i: (0, 0)),   # resident bias
            pl.BlockSpec((tile_b, C_pad), lambda i: (i, 0)),
        ],
        out_specs=pl.BlockSpec((tile_b, 1), lambda i: (i, 0)),
        compiler_params=_compiler_params(),
    )(x_p, w_pad, b_pad, yoh_p)
    return nll[:B, 0]


def torch_model_forward(x, w, b, y=None):
    """Reproduces TorchModel.forward:
       - y is None -> softmax(linear(x))                                   (B, 5)
       - y given   -> CrossEntropyLoss(softmax(linear(x)), argmax(y, 1))   scalar
    """
    if y is None:
        return linear_softmax(x, w, b)
    labels = jnp.argmax(y, axis=1)
    return jnp.mean(linear_softmax_nll(x, w, b, labels))


if __name__ == "__main__":
    batch, input_size, num_classes = 8, 32, 5

    key = jax.random.PRNGKey(0)
    kx, kw, kb, ky = jax.random.split(key, 4)

    x = jax.random.normal(kx, (batch, input_size), dtype=jnp.float32)
    w = jax.random.normal(kw, (num_classes, input_size), dtype=jnp.float32) * 0.1
    b = jax.random.normal(kb, (num_classes,), dtype=jnp.float32) * 0.1
    y_onehot = jax.nn.one_hot(
        jax.random.randint(ky, (batch,), 0, num_classes), num_classes,
        dtype=jnp.float32)

    # ---- inference path ----
    y_pred = jax.block_until_ready(torch_model_forward(x, w, b))
    assert y_pred.shape == (batch, num_classes)
    assert bool(jnp.all(jnp.isfinite(y_pred)))
    assert bool(jnp.allclose(jnp.sum(y_pred, axis=1), 1.0, atol=1e-3))

    # pure-JAX reference (loose tol: MXU matmul precision)
    ref_probs = jax.nn.softmax(x @ w.T + b, axis=1)
    assert bool(jnp.allclose(y_pred, ref_probs, atol=1e-2, rtol=1e-2))

    # ---- training path (fused per-row NLL kernel) ----
    loss = jax.block_until_ready(torch_model_forward(x, w, b, y_onehot))
    assert loss.shape == ()
    labels = jnp.argmax(y_onehot, axis=1)
    ref_loss = jnp.mean(-jnp.take_along_axis(
        jax.nn.log_softmax(ref_probs, axis=1), labels[:, None], axis=1)[:, 0])
    assert bool(jnp.allclose(loss, ref_loss, atol=1e-2, rtol=1e-2))

    # ---- exercise the batch-remainder (row padding) path ----
    x2 = jax.random.normal(kx, (batch + 2, input_size), dtype=jnp.float32)
    y_pred2 = jax.block_until_ready(torch_model_forward(x2, w, b))
    assert y_pred2.shape == (batch + 2, num_classes)

    print("KERNEL_OK")
</pallas_src>

<mosaic_0001>
module attributes {stable_mosaic.version = 11 : i64} {
  func.func @_linear_softmax_kernel(%arg0: i32, %arg1: memref<8x32xf32, #tpu.memory_space<vmem>>, %arg2: memref<128x32xf32, #tpu.memory_space<vmem>>, %arg3: memref<1x128xf32, #tpu.memory_space<vmem>>, %arg4: memref<8x128xf32, #tpu.memory_space<vmem>>) attributes {dimension_semantics = [#tpu.dimension_semantics<parallel>], iteration_bounds = array<i64: 1>, scalar_prefetch = 0 : i64, scratch_operands = 0 : i64, tpu.core_type = #tpu.core_type<tc>, window_params = [{transform_indices = @transform_0, window_bounds = array<i64: 8, 32>}, {pipeline_mode = #tpu.pipeline_mode<synchronous>, transform_indices = @transform_1, window_bounds = array<i64: 128, 32>}, {pipeline_mode = #tpu.pipeline_mode<synchronous>, transform_indices = @transform_2, window_bounds = array<i64: 1, 128>}, {transform_indices = @transform_3, window_bounds = array<i64: 8, 128>}]} {
    %c0 = arith.constant 0 : index
    %c0_0 = arith.constant 0 : index
    %0 = vector.load %arg1[%c0, %c0_0] : memref<8x32xf32, #tpu.memory_space<vmem>>, vector<8x32xf32>
    %c0_1 = arith.constant 0 : index
    %c0_2 = arith.constant 0 : index
    %1 = vector.load %arg2[%c0_1, %c0_2] : memref<128x32xf32, #tpu.memory_space<vmem>>, vector<128x32xf32>
    %cst = arith.constant dense<0.000000e+00> : vector<8x128xf32>
    %2 = tpu.matmul %0, %1, %cst {dimension_numbers = #tpu.dot_dimension_numbers<[1], [1], [0], [0], [0, 0, 1, 0], [], []>} : vector<8x32xf32>, vector<128x32xf32>, vector<8x128xf32> -> vector<8x128xf32>
    %c0_3 = arith.constant 0 : index
    %c0_4 = arith.constant 0 : index
    %3 = vector.load %arg3[%c0_3, %c0_4] : memref<1x128xf32, #tpu.memory_space<vmem>>, vector<1x128xf32>
    %4 = vector.broadcast %3 : vector<1x128xf32> to vector<8x128xf32>
    %5 = arith.addf %2, %4 : vector<8x128xf32>
    %cst_5 = arith.constant dense<0xFF800000> : vector<8xf32>
    %6 = vector.multi_reduction <maximumf>, %5, %cst_5 [1] : vector<8x128xf32> to vector<8xf32>
    %7 = vector.shape_cast %6 : vector<8xf32> to vector<8x1xf32>
    %8 = vector.broadcast %7 : vector<8x1xf32> to vector<8x128xf32>
    %9 = arith.subf %5, %8 : vector<8x128xf32>
    %10 = math.exp %9 : vector<8x128xf32>
    %cst_6 = arith.constant dense<0.000000e+00> : vector<8xf32>
    %11 = vector.multi_reduction <add>, %10, %cst_6 [1] : vector<8x128xf32> to vector<8xf32>
    %12 = vector.shape_cast %11 : vector<8xf32> to vector<8x1xf32>
    %13 = vector.broadcast %12 : vector<8x1xf32> to vector<8x128xf32>
    %14 = arith.divf %10, %13 : vector<8x128xf32>
    %c0_7 = arith.constant 0 : index
    %c0_8 = arith.constant 0 : index
    %15 = vector.load %arg4[%c0_7, %c0_8] : memref<8x128xf32, #tpu.memory_space<vmem>>, vector<8x128xf32>
    tpu.vector_store %arg4[%c0_7, %c0_8], %14 {strides = array<i32>} : memref<8x128xf32, #tpu.memory_space<vmem>>, vector<8x128xf32>,
    return
  }
  func.func @transform_0(%arg0: i32) -> (i32, i32) {
    %c0_i32 = arith.constant 0 : i32
    %c0_i32_0 = arith.constant 0 : i32
    return %arg0, %c0_i32 : i32, i32
  }
  func.func @transform_1(%arg0: i32) -> (i32, i32) {
    %c0_i32 = arith.constant 0 : i32
    %c0_i32_0 = arith.constant 0 : i32
    %c0_i32_1 = arith.constant 0 : i32
    return %c0_i32, %c0_i32_0 : i32, i32
  }
  func.func @transform_2(%arg0: i32) -> (i32, i32) {
    %c0_i32 = arith.constant 0 : i32
    %c0_i32_0 = arith.constant 0 : i32
    %c0_i32_1 = arith.constant 0 : i32
    return %c0_i32, %c0_i32_0 : i32, i32
  }
  func.func @transform_3(%arg0: i32) -> (i32, i32) {
    %c0_i32 = arith.constant 0 : i32
    %c0_i32_0 = arith.constant 0 : i32
    return %arg0, %c0_i32 : i32, i32
  }
}

</mosaic_0001>

<bundles_post_ra>
// kernel: tpu_custom_call.1
= control target key start
LH: loop header
LB: loop body
LE: loop exit
PB: predicated region body
PF: predicated region fallthrough
CT: control target
= control target key end

     0   :  { %vm36_vm0 = vcmask 261120   ;;  %s291_s0 = inlined_call_operand.vmem [shape: f32[8,32], index: 0, kind: input, shape index: {}]   ;;  %s292_s1 = inlined_call_operand.vmem [shape: f32[128,32], index: 1, kind: input, shape index: {}]   ;;  %s293_s2 = inlined_call_operand.vmem [shape: f32[1,128], index: 2, kind: input, shape index: {}]   ;;  %s294_s3 = inlined_call_operand.hbm [shape: f32[8,128], index: 3, kind: output, shape index: {}]  }
   0x1   :  { %v31_v0 = vld [vmem:[%s292_s1 + $0x78] sm:$0xff]  ;;  %v30_v1 = vld [vmem:[%s292_s1 + $0x70] sm:$0xff] }
   0x2   :  { %147 = vmatpush.xpose.msk.msra.mxu0 %vm36_vm0, %v31_v0 }
   0x3   :  { %8 = vsyncpa [#allocation3], 0  ;;  %v29_v2 = vld [vmem:[%s292_s1 + $0x68] sm:$0xff]  ;;  %v28_v3 = vld [vmem:[%s292_s1 + $0x60] sm:$0xff]  ;;  %s138_s22 = sshll.u32 %s294_s3, 4  ;;  %s139_s22 = int_to_ptr.hbm [resolvable:$true] %s138_s22 }
   0x4   :  { %v27_v4 = vld [vmem:[%s292_s1 + $0x58] sm:$0xff]  ;;  %v26_v5 = vld [vmem:[%s292_s1 + $0x50] sm:$0xff]  ;;  %v25_v6 = vld [vmem:[%s292_s1 + $0x48] sm:$0xff] }
   0x5   :  { %v24_v7 = vld [vmem:[%s292_s1 + $0x40] sm:$0xff]  ;;  %v23_v8 = vld [vmem:[%s292_s1 + $0x38] sm:$0xff]  ;;  %v22_v9 = vld [vmem:[%s292_s1 + $0x30] sm:$0xff] }
   0x6   :  { %148 = vmatpush.xpose.msk.msra.mxu0 %vm36_vm0, %v30_v1  ;;  %v21_v10 = vld [vmem:[%s292_s1 + $0x28] sm:$0xff]  ;;  %v20_v11 = vld [vmem:[%s292_s1 + $0x20] sm:$0xff]  ;;  %v19_v12 = vld [vmem:[%s292_s1 + $0x18] sm:$0xff] }
   0x7   :  { %v18_v13 = vld [vmem:[%s292_s1 + $0x10] sm:$0xff]  ;;  %v17_v14 = vld [vmem:[%s292_s1 + $0x8] sm:$0xff]  ;;  %v16_v15 = vld [vmem:[%s292_s1] sm:$0xff] }
   0x8   :  { %v15_v16 = vld [vmem:[%s291_s0] sm:$0xff]  ;;  %s196_s0 = smov [#allocation2]  }
   0x9   :  { %v165_v17 = vld [vmem:[%s293_s2] ss:$0 sm:$0xff]  ;;  %s136_s1 = sshll.u32 %s196_s0, 4  ;;  %s137_s1 = int_to_ptr.vmem [resolvable:$true] %s136_s1 }
   0xa   :  { %149 = vmatpush.xpose.msk.msra.mxu0 %vm36_vm0, %v29_v2 }
   0xe   :  { %150 = vmatpush.xpose.msk.msra.mxu0 %vm36_vm0, %v28_v3 }
  0x12   :  { %151 = vmatpush.xpose.msk.msra.mxu0 %vm36_vm0, %v27_v4 }
  0x16   :  { %152 = vmatpush.xpose.msk.msra.mxu0 %vm36_vm0, %v26_v5 }
  0x1a   :  { %153 = vmatpush.xpose.msk.msra.mxu0 %vm36_vm0, %v25_v6 }
  0x1e   :  { %154 = vmatpush.xpose.msk.msra.mxu0 %vm36_vm0, %v24_v7 }
  0x22   :  { %155 = vmatpush.xpose.msk.msra.mxu0 %vm36_vm0, %v23_v8 }
  0x26   :  { %156 = vmatpush.xpose.msk.msra.mxu0 %vm36_vm0, %v22_v9 }
  0x2a   :  { %157 = vmatpush.xpose.msk.msra.mxu0 %vm36_vm0, %v21_v10 }
  0x2e   :  { %158 = vmatpush.xpose.msk.msra.mxu0 %vm36_vm0, %v20_v11 }
  0x32   :  { %159 = vmatpush.xpose.msk.msra.mxu0 %vm36_vm0, %v19_v12 }
  0x36   :  { %160 = vmatpush.xpose.msk.msra.mxu0 %vm36_vm0, %v18_v13 }
  0x3a   :  { %161 = vmatpush.xpose.msk.msra.mxu0 %vm36_vm0, %v17_v14 }
  0x3e   :  { %162 = vmatpush.xpose.msk.msra.mxu0 %vm36_vm0, %v16_v15 }
  0x41   :  { %163 = vmatmul.msk.f32.vlgmr.msra.gmra.mxu0 %vm36_vm0, %v15_v16 }
  0xbe   :  { %v105_v18 = vpop.f32.mrf.mxu0 }
  0xbf   :  { %v106_v19 = vadd.f32 %v165_v17, %v105_v18 }
  0xc1   :  { %108 = vmax.xlane.f32.xlu0 %v106_v19 }
 0x134   :  { %v109_v20 = vpop.xlane.xlu0 %108 }
 0x135   :  { %v110_v21 = vsub.f32 %v106_v19, %v109_v20 }
 0x137   :  { %v111_v22 = vmul.f32 1.442695, %v110_v21 }
 0x139   :  { %166 = vpow2.f32 %v111_v22 }
 0x13f   :  { %v167_v23 = vpop.eup %166 }
 0x140   :  { %113 = vadd.xlane.f32.xlu0 %v167_v23 }
 0x1b3   :  { %v114_v24 = vpop.xlane.xlu0 %113 }
 0x1b4   :  { %168 = vrcp.f32 %v114_v24  ;;  %v126_v28 = vand.u32 2147483648, %v114_v24  ;;  %v124_v30 = vand.u32 2147483647, %v114_v24  ;;  %vm120_vm2 = vweird.f32 %v114_v24 }
 0x1b6   :  { %v127_v32 = vor.u32 1.1754944e-38, %v126_v28  ;;  %vm125_vm4 = vcmp.eq.f32.partialorder %v124_v30, 8.507059e+37 }
 0x1ba   :  { %v169_v25 = vpop.eup %168 }
 0x1bb   :  { %v116_v26 = vmul.f32 %v169_v25, %v114_v24  ;;  %vm121_vm1 = vweird.f32 %v169_v25 }
 0x1bc   :  { %vm122_vm3 = vmor %vm120_vm2, %vm121_vm1 }
 0x1bd   :  { %v117_v27 = vsub.f32 1.0, %v116_v26 }
 0x1bf   :  { %v118_v29 = vmul.f32 %v169_v25, %v117_v27 }
 0x1c1   :  { %v119_v31 = vadd.f32 %v169_v25, %v118_v29 }
 0x1c3   :  { %v123_v33 = vsel %vm122_vm3, %v169_v25, %v119_v31 }
 0x1c4   :  { %v128_v34 = vsel %vm125_vm4, %v127_v32, %v123_v33 }
 0x1c5   :  { %v129_v35 = vmul.f32 %v167_v23, %v128_v34 }
 0x1c7   :  { %130 = vst [vmem:[#allocation2] sm:$0xff] %v129_v35 }
 0x1c8   :  { %141 = dma.vmem_to_hbm [thread:$0]  %s137_s1, 128, %s139_s22, [#allocation3]  }
 0x1c9   :  { %194 = dma.done.wait [#allocation3], 128  }
 0x1ca   :  { %195 = vsyncadd [#allocation3], 4294967168 }
 0x1cb   :  { %146 = vsyncpa [#allocation3], 1 }

</bundles_post_ra>
